<compile_context>
chip_gen: v5e
topology: v5e:2x2
jax: 0.10.0
libtpu: 0.0.40
codegen_flags: <defaults>
</compile_context>

<pallas_src>
import jax
import jax.numpy as jnp
from jax.experimental import pallas as pl
from jax.experimental.pallas import tpu as pltpu

EPS = 1e-5


def basic_block_kernel(x_ref, wb1_ref, wb2_ref, bn1_ref, bn2_ref, pool_ref,
                       out_ref):
    """Single-invocation kernel (everything resident in VMEM at these sizes).

    x_ref   : (N, Hr, L_in)  f32   row-pair-packed NHWC input
                                   (lane index = p*(W*C) + w*C + c, Hr = H/pack)
    wb1_ref : (3*L_in, L_out)  bf16  banded conv1 weights (dy folded along K)
    wb2_ref : (3*L_out, L_out) bf16  banded conv2 weights
    bn1_ref : (2, L_out) f32  [gamma1 tiled over pack*W ; beta1 tiled]
    bn2_ref : (2, L_out) f32
    pool_ref: (L_out, L_out) f32 per-channel pooling matrix with 1/(N*H*W)
              folded in: (stats @ pool) = per-channel mean broadcast back to
              every packed lane.
    out_ref : (N, Hr, L_out) f32
    """
    N, Hr, L_in = x_ref.shape
    L = out_ref.shape[-1]           # pack * W * Cout
    NH = N * Hr

    pool = pool_ref[...]            # (L, L)

    def conv3x3_packed(x_bf16, wb_ref):
        """3x3 conv (pad=1, stride=1) on the packed layout as ONE matmul.

        x_bf16: (N, Hr, Lc) bf16. dx, the channel contraction, the within-pair
        dy taps and the cross-pair row seam all live inside the banded weight;
        only the +/-1 packed-row shift is done here (zero boundary rows).
        """
        Lc = x_bf16.shape[-1]
        zero_row = jnp.zeros((N, 1, Lc), jnp.bfloat16)
        tap_up = jnp.concatenate([zero_row, x_bf16[:, :Hr - 1, :]], axis=1)
        tap_dn = jnp.concatenate([x_bf16[:, 1:, :], zero_row], axis=1)
        lhs = jnp.concatenate([tap_up, x_bf16, tap_dn],
                              axis=-1).reshape(NH, 3 * Lc)
        return jnp.dot(lhs, wb_ref[...],
                       preferred_element_type=jnp.float32)   # (NH, L) f32

    def batchnorm(acc, bn_ref):
        """Training-mode BN with fused single-pass statistics."""
        col_sum = jnp.sum(acc, axis=0, keepdims=True)         # (1, L)
        col_sq = jnp.sum(acc * acc, axis=0, keepdims=True)    # (1, L)
        stats = jnp.concatenate([col_sum, col_sq], axis=0)    # (2, L)
        # Per-channel reduce over same-channel lanes + broadcast back, with
        # the 1/NHW normalization folded into `pool`.
        pooled = jnp.dot(stats, pool, preferred_element_type=jnp.float32)
        mean_l = pooled[0:1, :]                                # (1, L)
        var_l = jnp.maximum(pooled[1:2, :] - mean_l * mean_l, 0.0)
        scale_l = bn_ref[0:1, :] * jax.lax.rsqrt(var_l + EPS)  # EUP rsqrt
        bias_l = bn_ref[1:2, :] - mean_l * scale_l
        return acc * scale_l + bias_l                          # one FMA pass

    x_f32 = x_ref[...]                                         # (N, Hr, L_in)
    x_bf16 = x_f32.astype(jnp.bfloat16)                        # cast once

    # conv1 -> bn1 -> relu
    acc1 = conv3x3_packed(x_bf16, wb1_ref)                     # (NH, L) f32
    y = jnp.maximum(batchnorm(acc1, bn1_ref), 0.0)

    # conv2 -> bn2 -> +residual -> relu
    acc2 = conv3x3_packed(y.reshape(N, Hr, L).astype(jnp.bfloat16), wb2_ref)
    z = batchnorm(acc2, bn2_ref) + x_f32.reshape(NH, L_in)     # Cin == Cout
    out_ref[...] = jnp.maximum(z, 0.0).reshape(N, Hr, L)


def _banded_conv_weights(w_oihw, width, pack):
    """OIHW 3x3 weights -> (3*pack*W*Cin, pack*W*Cout) banded matmul weights.

    Row index    = dr*(pack*W*Cin) + p_i*(W*Cin) + w_i*Cin + ci   (dr = packed
    row offset -1/0/+1, p_i = row-within-pair, matching the lhs tap concat).
    Column index = p_o*(W*Cout) + w_o*Cout + co.
    Entry        = w[co, ci, ky, kx] with ky = pack*dr + p_i - p_o + 1 and
    kx = w_i - w_o + 1, zero when outside the 3x3 kernel (this also realises
    the H/W zero-padding and the cross-pair row seam).
    """
    w_hwio = jnp.transpose(w_oihw, (2, 3, 1, 0))            # (3, 3, Cin, Cout)
    kh, kw, cin, cout = w_hwio.shape
    dr = jnp.arange(3) - 1                                   # -1, 0, +1
    p_i = jnp.arange(pack)
    p_o = jnp.arange(pack)
    w_i = jnp.arange(width)
    w_o = jnp.arange(width)

    ky = pack * dr[:, None, None] + p_i[None, :, None] - p_o[None, None, :] + 1
    kx = w_i[:, None] - w_o[None, :] + 1                     # (W, W)
    ky_ok = (ky >= 0) & (ky < kh)                            # (3, pack, pack)
    kx_ok = (kx >= 0) & (kx < kw)

    kyc = jnp.clip(ky, 0, kh - 1)
    kxc = jnp.clip(kx, 0, kw - 1)
    # Gather -> (dr, p_i, w_i, p_o, w_o, cin, cout)
    band = w_hwio[kyc[:, :, None, :, None], kxc[None, None, :, None, :]]
    valid = ky_ok[:, :, None, :, None] & kx_ok[None, None, :, None, :]
    band = band * valid[..., None, None].astype(band.dtype)
    # -> (dr, p_i, w_i, cin, p_o, w_o, cout)
    band = jnp.transpose(band, (0, 1, 2, 5, 3, 4, 6))
    return band.reshape(3 * pack * width * cin, pack * width * cout)


def basic_block(x_nchw, w1_oihw, w2_oihw, gamma1, beta1, gamma2, beta2):
    """Wrapper: NCHW in / NCHW out, matching the PyTorch module."""
    N, Cin, H, W = x_nchw.shape
    Cout = w1_oihw.shape[0]
    assert Cin == Cout, "downsample=None requires inplanes == planes"

    # Pack adjacent H rows so the lane axis reaches 128 (full vregs, unmasked
    # stores) while keeping H divisible by the pack factor.
    pack = 1
    while pack * W * Cin < 128 and H % (pack * 2) == 0:
        pack *= 2
    Hr = H // pack
    L_in = pack * W * Cin
    L_out = pack * W * Cout

    # Packed lane-dense layout (no jnp.pad: padding handled inside the weight).
    x_pack = jnp.transpose(x_nchw, (0, 2, 3, 1)).reshape(
        N, Hr, L_in).astype(jnp.float32)

    wb1 = _banded_conv_weights(w1_oihw.astype(jnp.float32), W,
                               pack).astype(jnp.bfloat16)
    wb2 = _banded_conv_weights(w2_oihw.astype(jnp.float32), W,
                               pack).astype(jnp.bfloat16)

    # BN affine params pre-tiled to the packed lane layout (channel = lane % C).
    bn1 = jnp.stack([jnp.tile(gamma1, pack * W),
                     jnp.tile(beta1, pack * W)]).astype(jnp.float32)
    bn2 = jnp.stack([jnp.tile(gamma2, pack * W),
                     jnp.tile(beta2, pack * W)]).astype(jnp.float32)

    # Per-channel pooling matrix on the packed lanes, with 1/NHW folded in.
    lane = jnp.arange(L_out)
    pool = (lane[:, None] % Cout == lane[None, :] % Cout).astype(
        jnp.float32) / float(N * H * W)

    out_pack = pl.pallas_call(
        basic_block_kernel,
        out_shape=jax.ShapeDtypeStruct((N, Hr, L_out), jnp.float32),
        in_specs=[pl.BlockSpec(memory_space=pltpu.MemorySpace.VMEM)] * 6,
        out_specs=pl.BlockSpec(memory_space=pltpu.MemorySpace.VMEM),
    )(x_pack, wb1, wb2, bn1, bn2, pool)

    out = out_pack.reshape(N, H, W, Cout)
    return jnp.transpose(out, (0, 3, 1, 2))


def basic_block_ref(x, w1, w2, g1, b1, g2, b2):
    """Pure-JAX f32 reference (NCHW, same semantics as the PyTorch module)."""
    def conv(a, w):
        return jax.lax.conv_general_dilated(
            a, w, window_strides=(1, 1), padding=((1, 1), (1, 1)),
            dimension_numbers=('NCHW', 'OIHW', 'NCHW'))

    def bn(y, g, b):
        mean = jnp.mean(y, axis=(0, 2, 3), keepdims=True)
        var = jnp.mean((y - mean) ** 2, axis=(0, 2, 3), keepdims=True)
        return ((y - mean) * (g[None, :, None, None] * jax.lax.rsqrt(var + EPS))
                + b[None, :, None, None])

    out = jax.nn.relu(bn(conv(x, w1), g1, b1))
    out = bn(conv(out, w2), g2, b2) + x
    return jax.nn.relu(out)


if __name__ == "__main__":
    key = jax.random.PRNGKey(0)
    kx, kw1, kw2, kg1, kb1, kg2, kb2 = jax.random.split(key, 7)

    N, C, H, W = 2, 4, 16, 16          # inplanes = planes = 4, stride = 1
    x = jax.random.normal(kx, (N, C, H, W), jnp.float32)
    w1 = jax.random.normal(kw1, (C, C, 3, 3), jnp.float32) * 0.1
    w2 = jax.random.normal(kw2, (C, C, 3, 3), jnp.float32) * 0.1
    gamma1 = 1.0 + 0.1 * jax.random.normal(kg1, (C,), jnp.float32)
    beta1 = 0.1 * jax.random.normal(kb1, (C,), jnp.float32)
    gamma2 = 1.0 + 0.1 * jax.random.normal(kg2, (C,), jnp.float32)
    beta2 = 0.1 * jax.random.normal(kb2, (C,), jnp.float32)

    bb = jax.jit(basic_block)
    out = jax.block_until_ready(bb(x, w1, w2, gamma1, beta1, gamma2, beta2))
    ref = jax.block_until_ready(
        basic_block_ref(x, w1, w2, gamma1, beta1, gamma2, beta2))

    assert out.shape == (N, C, H, W)
    max_err = float(jnp.max(jnp.abs(out - ref)))
    # bf16 conv inputs/weights with f32 accumulation: errors are O(1e-2).
    assert jnp.allclose(out, ref, atol=3e-2, rtol=3e-2), (
        f"max abs err = {max_err}")
    print("KERNEL_OK")
</pallas_src>

<mosaic_0001>
module attributes {stable_mosaic.version = 11 : i64} {
  func.func @basic_block_kernel(%arg0: memref<2x8x128xf32, #tpu.memory_space<vmem>>, %arg1: memref<384x128xbf16, #tpu.memory_space<vmem>>, %arg2: memref<384x128xbf16, #tpu.memory_space<vmem>>, %arg3: memref<2x128xf32, #tpu.memory_space<vmem>>, %arg4: memref<2x128xf32, #tpu.memory_space<vmem>>, %arg5: memref<128x128xf32, #tpu.memory_space<vmem>>, %arg6: memref<2x8x128xf32, #tpu.memory_space<vmem>>) attributes {dimension_semantics = [], scalar_prefetch = 0 : i64, scratch_operands = 0 : i64, tpu.core_type = #tpu.core_type<tc>} {
    %c0 = arith.constant 0 : index
    %c0_0 = arith.constant 0 : index
    %0 = vector.load %arg5[%c0, %c0_0] : memref<128x128xf32, #tpu.memory_space<vmem>>, vector<128x128xf32>
    %c0_1 = arith.constant 0 : index
    %c0_2 = arith.constant 0 : index
    %c0_3 = arith.constant 0 : index
    %1 = vector.load %arg0[%c0_1, %c0_2, %c0_3] : memref<2x8x128xf32, #tpu.memory_space<vmem>>, vector<2x8x128xf32>
    %2 = arith.truncf %1 : vector<2x8x128xf32> to vector<2x8x128xbf16>
    %cst = arith.constant 0.000000e+00 : bf16
    %3 = vector.broadcast %cst : bf16 to vector<2x1x128xbf16>
    %4 = vector.extract_strided_slice %2 {offsets = [0, 0, 0], sizes = [2, 7, 128], strides = [1, 1, 1]} : vector<2x8x128xbf16> to vector<2x7x128xbf16>
    %5 = tpu.concatenate %3, %4 in 1 : vector<2x1x128xbf16>, vector<2x7x128xbf16> -> vector<2x8x128xbf16>
    %6 = vector.extract_strided_slice %2 {offsets = [0, 1, 0], sizes = [2, 7, 128], strides = [1, 1, 1]} : vector<2x8x128xbf16> to vector<2x7x128xbf16>
    %7 = tpu.concatenate %6, %3 in 1 : vector<2x7x128xbf16>, vector<2x1x128xbf16> -> vector<2x8x128xbf16>
    %8 = tpu.concatenate %5, %2, %7 in 2 : vector<2x8x128xbf16>, vector<2x8x128xbf16>, vector<2x8x128xbf16> -> vector<2x8x384xbf16>
    %9 = vector.shape_cast %8 : vector<2x8x384xbf16> to vector<16x384xbf16>
    %c0_4 = arith.constant 0 : index
    %c0_5 = arith.constant 0 : index
    %10 = vector.load %arg1[%c0_4, %c0_5] : memref<384x128xbf16, #tpu.memory_space<vmem>>, vector<384x128xbf16>
    %cst_6 = arith.constant dense<0.000000e+00> : vector<16x128xf32>
    %11 = tpu.matmul %9, %10, %cst_6 {dimension_numbers = #tpu.dot_dimension_numbers<[1], [0], [0], [1], [0, 0, 1, 1], [], []>} : vector<16x384xbf16>, vector<384x128xbf16>, vector<16x128xf32> -> vector<16x128xf32>
    %cst_7 = arith.constant dense<0.000000e+00> : vector<128xf32>
    %12 = vector.multi_reduction <add>, %11, %cst_7 [0] : vector<16x128xf32> to vector<128xf32>
    %13 = vector.shape_cast %12 : vector<128xf32> to vector<1x128xf32>
    %14 = arith.mulf %11, %11 : vector<16x128xf32>
    %cst_8 = arith.constant dense<0.000000e+00> : vector<128xf32>
    %15 = vector.multi_reduction <add>, %14, %cst_8 [0] : vector<16x128xf32> to vector<128xf32>
    %16 = vector.shape_cast %15 : vector<128xf32> to vector<1x128xf32>
    %17 = tpu.concatenate %13, %16 in 0 : vector<1x128xf32>, vector<1x128xf32> -> vector<2x128xf32>
    %cst_9 = arith.constant dense<0.000000e+00> : vector<2x128xf32>
    %18 = tpu.matmul %17, %0, %cst_9 {dimension_numbers = #tpu.dot_dimension_numbers<[1], [0], [0], [1], [0, 0, 1, 1], [], []>} : vector<2x128xf32>, vector<128x128xf32>, vector<2x128xf32> -> vector<2x128xf32>
    %19 = vector.extract_strided_slice %18 {offsets = [0, 0], sizes = [1, 128], strides = [1, 1]} : vector<2x128xf32> to vector<1x128xf32>
    %20 = vector.extract_strided_slice %18 {offsets = [1, 0], sizes = [1, 128], strides = [1, 1]} : vector<2x128xf32> to vector<1x128xf32>
    %21 = arith.mulf %19, %19 : vector<1x128xf32>
    %22 = arith.subf %20, %21 : vector<1x128xf32>
    %cst_10 = arith.constant 0.000000e+00 : f32
    %23 = vector.broadcast %cst_10 : f32 to vector<1x128xf32>
    %24 = arith.maximumf %22, %23 : vector<1x128xf32>
    %c0_11 = arith.constant 0 : index
    %c0_12 = arith.constant 0 : index
    %25 = vector.load %arg3[%c0_11, %c0_12] : memref<2x128xf32, #tpu.memory_space<vmem>>, vector<1x128xf32>
    %cst_13 = arith.constant 9.99999974E-6 : f32
    %26 = vector.broadcast %cst_13 : f32 to vector<1x128xf32>
    %27 = arith.addf %24, %26 : vector<1x128xf32>
    %28 = math.rsqrt %27 : vector<1x128xf32>
    %29 = arith.mulf %25, %28 : vector<1x128xf32>
    %c1 = arith.constant 1 : index
    %c0_14 = arith.constant 0 : index
    %30 = vector.load %arg3[%c1, %c0_14] : memref<2x128xf32, #tpu.memory_space<vmem>>, vector<1x128xf32>
    %31 = arith.mulf %19, %29 : vector<1x128xf32>
    %32 = arith.subf %30, %31 : vector<1x128xf32>
    %33 = vector.broadcast %29 : vector<1x128xf32> to vector<16x128xf32>
    %34 = arith.mulf %11, %33 : vector<16x128xf32>
    %35 = vector.broadcast %32 : vector<1x128xf32> to vector<16x128xf32>
    %36 = arith.addf %34, %35 : vector<16x128xf32>
    %cst_15 = arith.constant 0.000000e+00 : f32
    %37 = vector.broadcast %cst_15 : f32 to vector<16x128xf32>
    %38 = arith.maximumf %36, %37 : vector<16x128xf32>
    %39 = vector.shape_cast %38 : vector<16x128xf32> to vector<2x8x128xf32>
    %40 = arith.truncf %39 : vector<2x8x128xf32> to vector<2x8x128xbf16>
    %cst_16 = arith.constant 0.000000e+00 : bf16
    %41 = vector.broadcast %cst_16 : bf16 to vector<2x1x128xbf16>
    %42 = vector.extract_strided_slice %40 {offsets = [0, 0, 0], sizes = [2, 7, 128], strides = [1, 1, 1]} : vector<2x8x128xbf16> to vector<2x7x128xbf16>
    %43 = tpu.concatenate %41, %42 in 1 : vector<2x1x128xbf16>, vector<2x7x128xbf16> -> vector<2x8x128xbf16>
    %44 = vector.extract_strided_slice %40 {offsets = [0, 1, 0], sizes = [2, 7, 128], strides = [1, 1, 1]} : vector<2x8x128xbf16> to vector<2x7x128xbf16>
    %45 = tpu.concatenate %44, %41 in 1 : vector<2x7x128xbf16>, vector<2x1x128xbf16> -> vector<2x8x128xbf16>
    %46 = tpu.concatenate %43, %40, %45 in 2 : vector<2x8x128xbf16>, vector<2x8x128xbf16>, vector<2x8x128xbf16> -> vector<2x8x384xbf16>
    %47 = vector.shape_cast %46 : vector<2x8x384xbf16> to vector<16x384xbf16>
    %c0_17 = arith.constant 0 : index
    %c0_18 = arith.constant 0 : index
    %48 = vector.load %arg2[%c0_17, %c0_18] : memref<384x128xbf16, #tpu.memory_space<vmem>>, vector<384x128xbf16>
    %cst_19 = arith.constant dense<0.000000e+00> : vector<16x128xf32>
    %49 = tpu.matmul %47, %48, %cst_19 {dimension_numbers = #tpu.dot_dimension_numbers<[1], [0], [0], [1], [0, 0, 1, 1], [], []>} : vector<16x384xbf16>, vector<384x128xbf16>, vector<16x128xf32> -> vector<16x128xf32>
    %cst_20 = arith.constant dense<0.000000e+00> : vector<128xf32>
    %50 = vector.multi_reduction <add>, %49, %cst_20 [0] : vector<16x128xf32> to vector<128xf32>
    %51 = vector.shape_cast %50 : vector<128xf32> to vector<1x128xf32>
    %52 = arith.mulf %49, %49 : vector<16x128xf32>
    %cst_21 = arith.constant dense<0.000000e+00> : vector<128xf32>
    %53 = vector.multi_reduction <add>, %52, %cst_21 [0] : vector<16x128xf32> to vector<128xf32>
    %54 = vector.shape_cast %53 : vector<128xf32> to vector<1x128xf32>
    %55 = tpu.concatenate %51, %54 in 0 : vector<1x128xf32>, vector<1x128xf32> -> vector<2x128xf32>
    %cst_22 = arith.constant dense<0.000000e+00> : vector<2x128xf32>
    %56 = tpu.matmul %55, %0, %cst_22 {dimension_numbers = #tpu.dot_dimension_numbers<[1], [0], [0], [1], [0, 0, 1, 1], [], []>} : vector<2x128xf32>, vector<128x128xf32>, vector<2x128xf32> -> vector<2x128xf32>
    %57 = vector.extract_strided_slice %56 {offsets = [0, 0], sizes = [1, 128], strides = [1, 1]} : vector<2x128xf32> to vector<1x128xf32>
    %58 = vector.extract_strided_slice %56 {offsets = [1, 0], sizes = [1, 128], strides = [1, 1]} : vector<2x128xf32> to vector<1x128xf32>
    %59 = arith.mulf %57, %57 : vector<1x128xf32>
    %60 = arith.subf %58, %59 : vector<1x128xf32>
    %cst_23 = arith.constant 0.000000e+00 : f32
    %61 = vector.broadcast %cst_23 : f32 to vector<1x128xf32>
    %62 = arith.maximumf %60, %61 : vector<1x128xf32>
    %c0_24 = arith.constant 0 : index
    %c0_25 = arith.constant 0 : index
    %63 = vector.load %arg4[%c0_24, %c0_25] : memref<2x128xf32, #tpu.memory_space<vmem>>, vector<1x128xf32>
    %cst_26 = arith.constant 9.99999974E-6 : f32
    %64 = vector.broadcast %cst_26 : f32 to vector<1x128xf32>
    %65 = arith.addf %62, %64 : vector<1x128xf32>
    %66 = math.rsqrt %65 : vector<1x128xf32>
    %67 = arith.mulf %63, %66 : vector<1x128xf32>
    %c1_27 = arith.constant 1 : index
    %c0_28 = arith.constant 0 : index
    %68 = vector.load %arg4[%c1_27, %c0_28] : memref<2x128xf32, #tpu.memory_space<vmem>>, vector<1x128xf32>
    %69 = arith.mulf %57, %67 : vector<1x128xf32>
    %70 = arith.subf %68, %69 : vector<1x128xf32>
    %71 = vector.broadcast %67 : vector<1x128xf32> to vector<16x128xf32>
    %72 = arith.mulf %49, %71 : vector<16x128xf32>
    %73 = vector.broadcast %70 : vector<1x128xf32> to vector<16x128xf32>
    %74 = arith.addf %72, %73 : vector<16x128xf32>
    %75 = vector.shape_cast %1 : vector<2x8x128xf32> to vector<16x128xf32>
    %76 = arith.addf %74, %75 : vector<16x128xf32>
    %cst_29 = arith.constant 0.000000e+00 : f32
    %77 = vector.broadcast %cst_29 : f32 to vector<16x128xf32>
    %78 = arith.maximumf %76, %77 : vector<16x128xf32>
    %79 = vector.shape_cast %78 : vector<16x128xf32> to vector<2x8x128xf32>
    %c0_30 = arith.constant 0 : index
    %c0_31 = arith.constant 0 : index
    %c0_32 = arith.constant 0 : index
    %80 = vector.load %arg6[%c0_30, %c0_31, %c0_32] : memref<2x8x128xf32, #tpu.memory_space<vmem>>, vector<2x8x128xf32>
    tpu.vector_store %arg6[%c0_30, %c0_31, %c0_32], %79 {strides = array<i32>} : memref<2x8x128xf32, #tpu.memory_space<vmem>>, vector<2x8x128xf32>,
    return
  }
}

</mosaic_0001>

<bundles_post_ra>
// kernel: tile.23
= control target key start
LH: loop header
LB: loop body
LE: loop exit
PB: predicated region body
PF: predicated region fallthrough
CT: control target
= control target key end

     0   :  { %s40_s0 = inlined_call_operand.vmem [shape: f32[4], index: 0, kind: input, shape index: {}]   ;;  %s41_s1 = inlined_call_operand.vmem [shape: f32[32,4], index: 1, kind: output, shape index: {}]  }
   0x1   :  { %v4_v0 = vld [vmem:[%s40_s0] ss:$0 sm:$0xff] }
   0x2   :  { %5 = vst [vmem:[%s41_s1] sm:$0xff] %v4_v0 }
   0x3   :  { %12 = vst [vmem:[%s41_s1 + $0x8] sm:$0xff] %v4_v0 }
   0x4   :  { %13 = vst [vmem:[%s41_s1 + $0x10] sm:$0xff] %v4_v0 }
   0x5   :  { %14 = vst [vmem:[%s41_s1 + $0x18] sm:$0xff] %v4_v0 }

// kernel: tile.28
= control target key start
LH: loop header
LB: loop body
LE: loop exit
PB: predicated region body
PF: predicated region fallthrough
CT: control target
= control target key end

     0   :  { %s259_s10 = smov 124   ;;  %s260_s11 = smov 116   ;;  %vm3_vm0 = vcmask 31744   ;;  %vm9_vm1 = vcmask 1048544   ;;  %vm15_vm2 = vcmask 1015744   ;;  %vm21_vm3 = vcmask 982944   ;;  %s399_s0 = inlined_call_operand.vmem [shape: f32[32,4], index: 0, kind: input, shape index: {}]   ;;  %s400_s1 = inlined_call_operand.vmem [shape: f32[1,128], index: 1, kind: output, shape index: {}]  }
   0x1   :  { %v197_v0 = vld [vmem:[%s399_s0 + $0x1f] sm:$0x1]   ;;  %v199_v1 = vld [vmem:[%s399_s0 + $0x1d] sm:$0x1]   ;;  %v201_v2 = vld [vmem:[%s399_s0 + $0x1b] sm:$0x1]  }
   0x2   :  { %7 = vrot.lane.b32.xlu0 %v197_v0, %s259_s10  ;;  %19 = vrot.lane.b32.xlu1 %v199_v1, %s260_s11  ;;  %s261_s14 = smov 108   ;;  %v198_v3 = vld [vmem:[%s399_s0 + $0x1e] sm:$0x1]   ;;  %v200_v4 = vld [vmem:[%s399_s0 + $0x1c] sm:$0x1]   ;;  %s262_s19 = smov 120  }
   0x3   :  { %31 = vrot.lane.b32.xlu2 %v201_v2, %s261_s14  ;;  %s263_s20 = smov 112   ;;  %v202_v5 = vld [vmem:[%s399_s0 + $0x1a] sm:$0x1]   ;;  %s264_s23 = smov 104   ;;  %v203_v6 = vld [vmem:[%s399_s0 + $0x19] sm:$0x1]  }
   0x4   :  { %v204_v7 = vld [vmem:[%s399_s0 + $0x18] sm:$0x1]   ;;  %s265_s28 = smov 100   ;;  %s266_s29 = smov 96   ;;  %v205_v8 = vld [vmem:[%s399_s0 + $0x17] sm:$0x1]  }
   0x5   :  { %s267_s3 = smov 92   ;;  %v206_v9 = vld [vmem:[%s399_s0 + $0x16] sm:$0x1]   ;;  %v207_v10 = vld [vmem:[%s399_s0 + $0x15] sm:$0x1]   ;;  %s268_s8 = smov 88  }
   0x6   :  { %s269_s9 = smov 84   ;;  %v208_v11 = vld [vmem:[%s399_s0 + $0x14] sm:$0x1]   ;;  %s270_s12 = smov 80   ;;  %v209_v12 = vld [vmem:[%s399_s0 + $0x13] sm:$0x1]  }
   0x7   :  { %v210_v13 = vld [vmem:[%s399_s0 + $0x12] sm:$0x1]   ;;  %s271_s17 = smov 76   ;;  %s272_s18 = smov 72   ;;  %v211_v14 = vld [vmem:[%s399_s0 + $0x11] sm:$0x1]  }
   0x8   :  { %s273_s21 = smov 68   ;;  %v212_v15 = vld [vmem:[%s399_s0 + $0x10] sm:$0x1]   ;;  %v213_v16 = vld [vmem:[%s399_s0 + $0xf] sm:$0x1]   ;;  %s274_s26 = smov 64  }
   0x9   :  { %s275_s27 = smov 60   ;;  %v214_v17 = vld [vmem:[%s399_s0 + $0xe] sm:$0x1]   ;;  %s276_s30 = smov 56   ;;  %v215_v18 = vld [vmem:[%s399_s0 + $0xd] sm:$0x1]  }
   0xa   :  { %13 = vrot.lane.b32.xlu0 %v198_v3, %s262_s19  ;;  %25 = vrot.lane.b32.xlu1 %v200_v4, %s263_s20  ;;  %v216_v19 = vld [vmem:[%s399_s0 + $0xc] sm:$0x1]   ;;  %s277_s6 = smov 52   ;;  %s278_s7 = smov 48   ;;  %v217_v20 = vld [vmem:[%s399_s0 + $0xb] sm:$0x1]  }
   0xb   :  { %37 = vrot.lane.b32.xlu2 %v202_v5, %s264_s23  ;;  %s279_s10 = smov 44   ;;  %v218_v21 = vld [vmem:[%s399_s0 + $0xa] sm:$0x1]   ;;  %v219_v22 = vld [vmem:[%s399_s0 + $0x9] sm:$0x1]   ;;  %s280_s15 = smov 40  }
   0xc   :  { %s281_s16 = smov 36   ;;  %v220_v23 = vld [vmem:[%s399_s0 + $0x8] sm:$0x1]   ;;  %s282_s19 = smov 32   ;;  %v221_v24 = vld [vmem:[%s399_s0 + $0x7] sm:$0x1]  }
   0xd   :  { %v222_v25 = vld [vmem:[%s399_s0 + $0x6] sm:$0x1]   ;;  %s283_s24 = smov 28   ;;  %s284_s25 = smov 24   ;;  %v223_v26 = vld [vmem:[%s399_s0 + $0x5] sm:$0x1]  }
   0xe   :  { %v224_v27 = vld [vmem:[%s399_s0 + $0x4] sm:$0x1]   ;;  %v225_v28 = vld [vmem:[%s399_s0 + $0x3] sm:$0x1]   ;;  %s286_s4 = smov 16   ;;  %s287_s5 = smov 12  }
   0xf   :  { %v226_v29 = vld [vmem:[%s399_s0 + $0x2] sm:$0x1]   ;;  %v227_v30 = vld [vmem:[%s399_s0 + $0x1] sm:$0x1]   ;;  %s289_s11 = smov 4   ;;  %vm27_vm4 = vcmask 950144  }
  0x10   :  { %v2_v31 = vld [vmem:[%s399_s0] sm:$0x1]   ;;  %vm33_vm5 = vcmask 917344   ;;  %vm39_vm6 = vcmask 884544   ;;  %vm45_vm7 = vcmask 851744   ;;  %vm51_vm8 = vcmask 818944  }
  0x11   :  { %4 = vst.msk [vmem:[#allocation0] sm:$0x1] %vm3_vm0, %v2_v31   ;;  %vm57_vm9 = vcmask 786144   ;;  %vm63_vm10 = vcmask 753344   ;;  %vm69_vm11 = vcmask 720544   ;;  %vm75_vm12 = vcmask 687744  }
  0x12   :  { %43 = vrot.lane.b32.xlu0 %v203_v6, %s265_s28  ;;  %49 = vrot.lane.b32.xlu1 %v204_v7, %s266_s29  ;;  %s285_s28 = smov 20   ;;  %vm81_vm13 = vcmask 654944   ;;  %vm87_vm14 = vcmask 622144   ;;  %vm93_vm15 = vcmask 589344   ;;  %vm99_vm0 = vcmask 556544  }
  0x13   :  { %55 = vrot.lane.b32.xlu2 %v205_v8, %s267_s3 }
  0x1a   :  { %61 = vrot.lane.b32.xlu0 %v206_v9, %s268_s8  ;;  %67 = vrot.lane.b32.xlu1 %v207_v10, %s269_s9  ;;  %s288_s8 = smov 8  }
  0x1b   :  { %73 = vrot.lane.b32.xlu2 %v208_v11, %s270_s12 }
  0x22   :  { %79 = vrot.lane.b32.xlu0 %v209_v12, %s271_s17  ;;  %85 = vrot.lane.b32.xlu1 %v210_v13, %s272_s18 }
  0x23   :  { %91 = vrot.lane.b32.xlu2 %v211_v14, %s273_s21 }
  0x2a   :  { %97 = vrot.lane.b32.xlu0 %v212_v15, %s274_s26  ;;  %103 = vrot.lane.b32.xlu1 %v213_v16, %s275_s27 }
  0x2b   :  { %109 = vrot.lane.b32.xlu2 %v214_v17, %s276_s30 }
  0x32   :  { %115 = vrot.lane.b32.xlu0 %v215_v18, %s277_s6  ;;  %121 = vrot.lane.b32.xlu1 %v216_v19, %s278_s7 }
  0x33   :  { %127 = vrot.lane.b32.xlu2 %v217_v20, %s279_s10 }
  0x3a   :  { %133 = vrot.lane.b32.xlu0 %v218_v21, %s280_s15  ;;  %139 = vrot.lane.b32.xlu1 %v219_v22, %s281_s16 }
  0x3b   :  { %145 = vrot.lane.b32.xlu2 %v220_v23, %s282_s19 }
  0x42   :  { %151 = vrot.lane.b32.xlu0 %v221_v24, %s283_s24  ;;  %157 = vrot.lane.b32.xlu1 %v222_v25, %s284_s25 }
  0x43   :  { %163 = vrot.lane.b32.xlu2 %v223_v26, %s285_s28 }
  0x4a   :  { %169 = vrot.lane.b32.xlu0 %v224_v27, %s286_s4  ;;  %175 = vrot.lane.b32.xlu1 %v225_v28, %s287_s5 }
  0x4b   :  { %181 = vrot.lane.b32.xlu2 %v226_v29, %s288_s8 }
  0x52   :  { %187 = vrot.lane.b32.xlu0 %v227_v30, %s289_s11 }
  0x5d   :  { %v32_v32 = vpop.permute.xlu2 %31  }
  0x65   :  { %v38_v33 = vpop.permute.xlu2 %37  }
  0x6d   :  { %v56_v34 = vpop.permute.xlu2 %55  }
  0x74   :  { %v8_v35 = vpop.permute.xlu0 %7   ;;  %v20_v36 = vpop.permute.xlu1 %19  }
  0x75   :  { %10 = vst.msk [vmem:[#allocation0] sm:$0x1] %vm9_vm1, %v8_v35   ;;  %v74_v37 = vpop.permute.xlu2 %73   ;;  %vm105_vm1 = vcmask 523744  }
  0x7c   :  { %v14_v38 = vpop.permute.xlu0 %13   ;;  %v26_v39 = vpop.permute.xlu1 %25  }
  0x7d   :  { %16 = vst.msk [vmem:[#allocation0] sm:$0x1] %vm15_vm2, %v14_v38   ;;  %v92_v40 = vpop.permute.xlu2 %91   ;;  %vm111_vm2 = vcmask 490944  }
  0x7e   :  { %22 = vst.msk [vmem:[#allocation0] sm:$0x1] %vm21_vm3, %v20_v36   ;;  %vm117_vm3 = vcmask 458144  }
  0x7f   :  { %28 = vst.msk [vmem:[#allocation0] sm:$0x1] %vm27_vm4, %v26_v39   ;;  %vm123_vm4 = vcmask 425344  }
  0x80   :  { %34 = vst.msk [vmem:[#allocation0] sm:$0x1] %vm33_vm5, %v32_v32   ;;  %vm129_vm5 = vcmask 392544  }
  0x81   :  { %40 = vst.msk [vmem:[#allocation0] sm:$0x1] %vm39_vm6, %v38_v33   ;;  %vm135_vm6 = vcmask 359744  }
  0x84   :  { %v44_v41 = vpop.permute.xlu0 %43   ;;  %v50_v42 = vpop.permute.xlu1 %49  }
  0x85   :  { %46 = vst.msk [vmem:[#allocation0] sm:$0x1] %vm45_vm7, %v44_v41   ;;  %v110_v43 = vpop.permute.xlu2 %109   ;;  %vm141_vm7 = vcmask 326944  }
  0x86   :  { %52 = vst.msk [vmem:[#allocation0] sm:$0x1] %vm51_vm8, %v50_v42   ;;  %vm147_vm8 = vcmask 294144  }
  0x87   :  { %58 = vst.msk [vmem:[#allocation0] sm:$0x1] %vm57_vm9, %v56_v34   ;;  %vm153_vm9 = vcmask 261344  }
  0x8c   :  { %v62_v44 = vpop.permute.xlu0 %61   ;;  %v68_v45 = vpop.permute.xlu1 %67  }
  0x8d   :  { %64 = vst.msk [vmem:[#allocation0] sm:$0x1] %vm63_vm10, %v62_v44   ;;  %v128_v46 = vpop.permute.xlu2 %127   ;;  %vm159_vm10 = vcmask 228544  }
  0x8e   :  { %70 = vst.msk [vmem:[#allocation0] sm:$0x1] %vm69_vm11, %v68_v45   ;;  %vm165_vm11 = vcmask 195744  }
  0x8f   :  { %76 = vst.msk [vmem:[#allocation0] sm:$0x1] %vm75_vm12, %v74_v37   ;;  %vm171_vm12 = vcmask 162944  }
  0x94   :  { %v80_v47 = vpop.permute.xlu0 %79   ;;  %v86_v48 = vpop.permute.xlu1 %85  }
  0x95   :  { %82 = vst.msk [vmem:[#allocation0] sm:$0x1] %vm81_vm13, %v80_v47   ;;  %v146_v49 = vpop.permute.xlu2 %145   ;;  %vm177_vm13 = vcmask 130144  }
  0x96   :  { %88 = vst.msk [vmem:[#allocation0] sm:$0x1] %vm87_vm14, %v86_v48   ;;  %vm183_vm14 = vcmask 97344  }
  0x97   :  { %94 = vst.msk [vmem:[#allocation0] sm:$0x1] %vm93_vm15, %v92_v40   ;;  %vm189_vm15 = vcmask 64544  }
  0x9c   :  { %v98_v50 = vpop.permute.xlu0 %97   ;;  %v104_v51 = vpop.permute.xlu1 %103  }
  0x9d   :  { %100 = vst.msk [vmem:[#allocation0] sm:$0x1] %vm99_vm0, %v98_v50   ;;  %v164_v52 = vpop.permute.xlu2 %163  }
  0x9e   :  { %106 = vst.msk [vmem:[#allocation0] sm:$0x1] %vm105_vm1, %v104_v51  }
  0x9f   :  { %112 = vst.msk [vmem:[#allocation0] sm:$0x1] %vm111_vm2, %v110_v43  }
  0xa4   :  { %v116_v53 = vpop.permute.xlu0 %115   ;;  %v122_v54 = vpop.permute.xlu1 %121  }
  0xa5   :  { %118 = vst.msk [vmem:[#allocation0] sm:$0x1] %vm117_vm3, %v116_v53   ;;  %v182_v55 = vpop.permute.xlu2 %181  }
  0xa6   :  { %124 = vst.msk [vmem:[#allocation0] sm:$0x1] %vm123_vm4, %v122_v54  }
  0xa7   :  { %130 = vst.msk [vmem:[#allocation0] sm:$0x1] %vm129_vm5, %v128_v46  }
  0xac   :  { %v134_v56 = vpop.permute.xlu0 %133   ;;  %v140_v57 = vpop.permute.xlu1 %139  }
  0xad   :  { %136 = vst.msk [vmem:[#allocation0] sm:$0x1] %vm135_vm6, %v134_v56  }
  0xae   :  { %142 = vst.msk [vmem:[#allocation0] sm:$0x1] %vm141_vm7, %v140_v57  }
  0xaf   :  { %148 = vst.msk [vmem:[#allocation0] sm:$0x1] %vm147_vm8, %v146_v49  }
  0xb4   :  { %v152_v58 = vpop.permute.xlu0 %151   ;;  %v158_v59 = vpop.permute.xlu1 %157  }
  0xb5   :  { %154 = vst.msk [vmem:[#allocation0] sm:$0x1] %vm153_vm9, %v152_v58  }
  0xb6   :  { %160 = vst.msk [vmem:[#allocation0] sm:$0x1] %vm159_vm10, %v158_v59  }
  0xb7   :  { %166 = vst.msk [vmem:[#allocation0] sm:$0x1] %vm165_vm11, %v164_v52  }
  0xbc   :  { %v170_v60 = vpop.permute.xlu0 %169   ;;  %v176_v61 = vpop.permute.xlu1 %175  }
  0xbd   :  { %172 = vst.msk [vmem:[#allocation0] sm:$0x1] %vm171_vm12, %v170_v60  }
  0xbe   :  { %178 = vst.msk [vmem:[#allocation0] sm:$0x1] %vm177_vm13, %v176_v61  }
  0xbf   :  { %184 = vst.msk [vmem:[#allocation0] sm:$0x1] %vm183_vm14, %v182_v55  }
  0xc4   :  { %v188_v62 = vpop.permute.xlu0 %187  }
  0xc5   :  { %190 = vst.msk [vmem:[#allocation0] sm:$0x1] %vm189_vm15, %v188_v62  }
  0xcc   :  { %v193_v63 = vld [vmem:[#allocation0] sm:$0x1] }
  0xcd   :  { %196 = vst [vmem:[%s400_s1] sm:$0x1] %v193_v63 }

// kernel: basic_block.1
= control target key start
LH: loop header
LB: loop body
LE: loop exit
PB: predicated region body
PF: predicated region fallthrough
CT: control target
= control target key end

     0   :  { %vm66_vm0 = vcmask 1040384   ;;  %vm67_vm1 = vsmask.f32 256  ;;  %vm77_vm2 = vcmask 1043456   ;;  %vm78_vm3 = vsmask.f32 3328  ;;  %s1308_s1 = inlined_call_operand.vmem [shape: bf16[384,128], index: 1, kind: input, shape index: {}]   ;;  %s1309_s0 = inlined_call_operand.vmem [shape: f32[2,8,128], index: 0, kind: input, shape index: {}]   ;;  %s1310_s5 = inlined_call_operand.vmem [shape: f32[128,128], index: 5, kind: input, shape index: {}]   ;;  %s1311_s2 = inlined_call_operand.vmem [shape: bf16[384,128], index: 2, kind: input, shape index: {}]   ;;  %s1312_s3 = inlined_call_operand.vmem [shape: f32[2,128], index: 3, kind: input, shape index: {}]   ;;  %s1313_s4 = inlined_call_operand.vmem [shape: f32[2,128], index: 4, kind: input, shape index: {}]   ;;  %s1314_s6 = inlined_call_operand.vmem [shape: f32[2,8,128], index: 6, kind: output, shape index: {}]  }
   0x1   :  { %v960_v0 = vld [vmem:[%s1308_s1 + $0x38] sm:$0xff]  ;;  %v959_v3 = vld [vmem:[%s1308_s1 + $0x30] sm:$0xff]  ;;  %v958_v6 = vld [vmem:[%s1308_s1 + $0x28] sm:$0xff] }
   0x2   :  { %v968_v1 = vld [vmem:[%s1308_s1 + $0x78] sm:$0xff]  ;;  %288 = vmatpush.bf16.msra.mxu0 %v960_v0  ;;  %v967_v4 = vld [vmem:[%s1308_s1 + $0x70] sm:$0xff]  ;;  %v966_v7 = vld [vmem:[%s1308_s1 + $0x68] sm:$0xff] }
   0x3   :  { %v976_v2 = vld [vmem:[%s1308_s1 + $0xb8] sm:$0xff]  ;;  %302 = vmatpush.bf16.msra.mxu1 %v968_v1  ;;  %v975_v5 = vld [vmem:[%s1308_s1 + $0xb0] sm:$0xff]  ;;  %v974_v8 = vld [vmem:[%s1308_s1 + $0xa8] sm:$0xff] }
   0x4   :  { %316 = vmatpush.bf16.msra.mxu2 %v976_v2  ;;  %v1070_v9 = vld [vmem:[%s1309_s0] sm:$0xff]  ;;  %v1075_v10 = vld [vmem:[%s1309_s0 + $0x8] sm:$0xff]  ;;  %v956_v20 = vld [vmem:[%s1308_s1 + $0x18] sm:$0xff] }
   0x5   :  { %v42_v11 = vpack.c.bf16 %v1070_v9, %v1070_v9  ;;  %v43_v12 = vpack.c.bf16 %v1075_v10, %v1075_v10  ;;  %v957_v13 = vld [vmem:[%s1308_s1 + $0x20] sm:$0xff]  ;;  %v964_v21 = vld [vmem:[%s1308_s1 + $0x58] sm:$0xff]  ;;  %v955_v31 = vld [vmem:[%s1308_s1 + $0x10] sm:$0xff] }
   0x6   :  { %289 = vmatpush.bf16.msra.mxu0 %v959_v3  ;;  %v965_v14 = vld [vmem:[%s1308_s1 + $0x60] sm:$0xff]  ;;  %v972_v22 = vld [vmem:[%s1308_s1 + $0x98] sm:$0xff]  ;;  %v963_v32 = vld [vmem:[%s1308_s1 + $0x50] sm:$0xff] }
   0x7   :  { %303 = vmatpush.bf16.msra.mxu1 %v967_v4  ;;  %v973_v15 = vld [vmem:[%s1308_s1 + $0xa0] sm:$0xff]  ;;  %v46_v16 = vunpack.c.l.b16 %v42_v11  ;;  %v47_v17 = vunpack.c.l.b16 %v43_v12  ;;  %v971_v33 = vld [vmem:[%s1308_s1 + $0x90] sm:$0xff]  ;;  %vm1110_vm4 = vmand %vm66_vm0, %vm67_vm1 }
   0x8   :  { %317 = vmatpush.bf16.msra.mxu2 %v975_v5  ;;  %vm1116_vm5 = vmand %vm77_vm2, %vm78_vm3  ;;  %v954_v40 = vld [vmem:[%s1308_s1 + $0x8] sm:$0xff]  ;;  %v953_v49 = vld [vmem:[%s1308_s1] sm:$0xff] }
   0x9   :  { %v48_v18 = vpack.c.b16 %v46_v16, %v46_v16  ;;  %v49_v19 = vpack.c.b16 %v47_v17, %v47_v17  ;;  %v962_v41 = vld [vmem:[%s1308_s1 + $0x48] sm:$0xff]  ;;  %v961_v50 = vld [vmem:[%s1308_s1 + $0x40] sm:$0xff]  ;;  %v139_v55 = vpack.c.b16 %v47_v17, %v46_v16  ;;  %v39_v57 = vld [vmem:[%s1310_s5 + $0x78] sm:$0xff] }
   0xa   :  { %290 = vmatpush.bf16.msra.mxu0 %v958_v6  ;;  %v970_v44 = vld [vmem:[%s1308_s1 + $0x88] sm:$0xff]  ;;  %v969_v53 = vld [vmem:[%s1308_s1 + $0x80] sm:$0xff]  ;;  %v38_v58 = vld [vmem:[%s1310_s5 + $0x70] sm:$0xff]  ;;  %348 = vmatpush.msra.mxu3 %v39_v57 }
   0xb   :  { %304 = vmatpush.bf16.msra.mxu1 %v966_v7  ;;  %v51_v23 = vshrl.u32 %v48_v18, 16  ;;  %v54_v24 = vshll.u32 %v48_v18, 16  ;;  %v58_v25 = vshrl.u32 %v49_v19, 16  ;;  %v61_v26 = vshll.u32 %v49_v19, 16  ;;  %v37_v59 = vld [vmem:[%s1310_s5 + $0x68] sm:$0xff]  ;;  %v36_v60 = vld [vmem:[%s1310_s5 + $0x60] sm:$0xff] }
   0xc   :  { %318 = vmatpush.bf16.msra.mxu2 %v974_v8  ;;  %349 = vmatpush.msra.mxu3 %v38_v58  ;;  %v35_v61 = vld [vmem:[%s1310_s5 + $0x58] sm:$0xff]  ;;  %v34_v62 = vld [vmem:[%s1310_s5 + $0x50] sm:$0xff]  ;;  %v33_v63 = vld [vmem:[%s1310_s5 + $0x48] sm:$0xff] }
   0xd   :  { %v53_v27 = vrot.slane %v51_v23, 7  ;;  %v60_v28 = vrot.slane %v58_v25, 7  ;;  %v71_v29 = vrot.slane %v54_v24, 1  ;;  %v73_v30 = vrot.slane %v61_v26, 1  ;;  %v32_v0 = vld [vmem:[%s1310_s5 + $0x40] sm:$0xff]  ;;  %v31_v1 = vld [vmem:[%s1310_s5 + $0x38] sm:$0xff] }
   0xe   :  { %291 = vmatpush.bf16.msra.mxu0 %v957_v13  ;;  %350 = vmatpush.msra.mxu3 %v37_v59  ;;  %v30_v2 = vld [vmem:[%s1310_s5 + $0x30] sm:$0xff]  ;;  %v29_v3 = vld [vmem:[%s1310_s5 + $0x28] sm:$0xff]  ;;  %v28_v4 = vld [vmem:[%s1310_s5 + $0x20] sm:$0xff] }
   0xf   :  { %305 = vmatpush.bf16.msra.mxu1 %v965_v14  ;;  %v56_v34 = vor.u32 %v54_v24, %v53_v27  ;;  %v63_v35 = vor.u32 %v61_v26, %v60_v28  ;;  %v72_v37 = vor.u32 %v71_v29, %v51_v23  ;;  %v74_v38 = vor.u32 %v73_v30, %v58_v25  ;;  %v27_v5 = vld [vmem:[%s1310_s5 + $0x18] sm:$0xff]  ;;  %v26_v6 = vld [vmem:[%s1310_s5 + $0x10] sm:$0xff]  ;;  %v25_v7 = vld [vmem:[%s1310_s5 + $0x8] sm:$0xff] }
  0x10   :  { %319 = vmatpush.bf16.msra.mxu2 %v973_v15  ;;  %351 = vmatpush.msra.mxu3 %v36_v60  ;;  %v24_v8 = vld [vmem:[%s1310_s5] sm:$0xff] }
  0x11   :  { %v69_v42 = vsel %vm1110_vm4, 0, %v56_v34  ;;  %v70_v43 = vsel %vm1110_vm4, 0, %v63_v35  ;;  %v80_v45 = vsel %vm1116_vm5, %v72_v37, 0  ;;  %v81_v46 = vsel %vm1116_vm5, %v74_v38, 0 }
  0x12   :  { %292 = vmatpush.bf16.msra.mxu0 %v956_v20  ;;  %v86_v47 = vunpack.c.l.b16 %v69_v42  ;;  %v88_v48 = vunpack.c.l.b16 %v70_v43  ;;  %v87_v51 = vunpack.c.l.b16 %v80_v45  ;;  %v89_v52 = vunpack.c.l.b16 %v81_v46  ;;  %352 = vmatpush.msra.mxu3 %v35_v61  ;;  %v990_v42 = vld [vmem:[%s1311_s2 + $0x68] sm:$0xff]  ;;  %v984_v43 = vld [vmem:[%s1311_s2 + $0x38] sm:$0xff]  ;;  %v989_v45 = vld [vmem:[%s1311_s2 + $0x60] sm:$0xff] }
  0x13   :  { %306 = vmatpush.bf16.msra.mxu1 %v964_v21  ;;  %v983_v46 = vld [vmem:[%s1311_s2 + $0x30] sm:$0xff] }
  0x14   :  { %320 = vmatpush.bf16.msra.mxu2 %v972_v22  ;;  %v138_v54 = vpack.c.b16 %v88_v48, %v86_v47  ;;  %v140_v56 = vpack.c.b16 %v89_v52, %v87_v51  ;;  %353 = vmatpush.msra.mxu3 %v34_v62  ;;  %v999_v47 = vld [vmem:[%s1311_s2 + $0xb0] sm:$0xff]  ;;  %v982_v52 = vld [vmem:[%s1311_s2 + $0x28] sm:$0xff] }
  0x16   :  { %293 = vmatpush.bf16.msra.mxu0 %v955_v31  ;;  %354 = vmatpush.msra.mxu3 %v33_v63 }
  0x17   :  { %307 = vmatpush.bf16.msra.mxu1 %v963_v32 }
  0x18   :  { %321 = vmatpush.bf16.msra.mxu2 %v971_v33  ;;  %355 = vmatpush.msra.mxu3 %v32_v0 }
  0x1a   :  { %294 = vmatpush.bf16.msra.mxu0 %v954_v40  ;;  %356 = vmatpush.msra.mxu3 %v31_v1  ;;  %v992_v40 = vld [vmem:[%s1311_s2 + $0x78] sm:$0xff] }
  0x1b   :  { %308 = vmatpush.bf16.msra.mxu1 %v962_v41  ;;  %v991_v41 = vld [vmem:[%s1311_s2 + $0x70] sm:$0xff] }
  0x1c   :  { %322 = vmatpush.bf16.msra.mxu2 %v970_v44  ;;  %357 = vmatpush.msra.mxu3 %v30_v2  ;;  %v1000_v44 = vld [vmem:[%s1311_s2 + $0xb8] sm:$0xff] }
  0x1e   :  { %295 = vmatpush.bf16.msra.mxu0 %v953_v49  ;;  %358 = vmatpush.msra.mxu3 %v29_v3  ;;  %v988_v49 = vld [vmem:[%s1311_s2 + $0x58] sm:$0xff] }
  0x1f   :  { %309 = vmatpush.bf16.msra.mxu1 %v961_v50 }
  0x20   :  { %323 = vmatpush.bf16.msra.mxu2 %v969_v53  ;;  %359 = vmatpush.msra.mxu3 %v28_v4  ;;  %v998_v53 = vld [vmem:[%s1311_s2 + $0xa8] sm:$0xff] }
  0x21   :  { %296 = vmatmul.bf16.vlgmr.msra.gmra.mxu0 %v138_v54  ;;  %v987_v54 = vld [vmem:[%s1311_s2 + $0x50] sm:$0xff] }
  0x22   :  { %310 = vmatmul.bf16.vlgmr.msra.gmra.mxu1 %v139_v55  ;;  %360 = vmatpush.msra.mxu3 %v27_v5 }
  0x23   :  { %324 = vmatmul.bf16.vlgmr.msra.gmra.mxu2 %v140_v56  ;;  %655 = vmatpush.bf16.msrb.mxu1 %v992_v40  ;;  %v981_v56 = vld [vmem:[%s1311_s2 + $0x20] sm:$0xff] }
  0x24   :  { %361 = vmatpush.msra.mxu3 %v26_v6  ;;  %641 = vmatpush.bf16.msrb.mxu0 %v984_v43 }
  0x25   :  { %669 = vmatpush.bf16.msrb.mxu2 %v1000_v44 }
  0x26   :  { %362 = vmatpush.msra.mxu3 %v25_v7 }
  0x27   :  { %656 = vmatpush.bf16.msrb.mxu1 %v991_v41 }
  0x28   :  { %363 = vmatpush.msra.mxu3 %v24_v8  ;;  %642 = vmatpush.bf16.msrb.mxu0 %v983_v46 }
  0x29   :  { %670 = vmatpush.bf16.msrb.mxu2 %v999_v47 }
  0x2a   :  { %700 = vmatpush.msrb.mxu3 %v39_v57  ;;  %v997_v57 = vld [vmem:[%s1311_s2 + $0xa0] sm:$0xff] }
  0x2b   :  { %657 = vmatpush.bf16.msrb.mxu1 %v990_v42 }
  0x2c   :  { %701 = vmatpush.msrb.mxu3 %v38_v58  ;;  %643 = vmatpush.bf16.msrb.mxu0 %v982_v52  ;;  %v986_v58 = vld [vmem:[%s1311_s2 + $0x48] sm:$0xff] }
  0x2d   :  { %671 = vmatpush.bf16.msrb.mxu2 %v998_v53 }
  0x2e   :  { %702 = vmatpush.msrb.mxu3 %v37_v59 }
  0x2f   :  { %658 = vmatpush.bf16.msrb.mxu1 %v989_v45 }
  0x30   :  { %703 = vmatpush.msrb.mxu3 %v36_v60  ;;  %644 = vmatpush.bf16.msrb.mxu0 %v981_v56 }
  0x31   :  { %672 = vmatpush.bf16.msrb.mxu2 %v997_v57 }
  0x32   :  { %704 = vmatpush.msrb.mxu3 %v35_v61  ;;  %v980_v61 = vld [vmem:[%s1311_s2 + $0x18] sm:$0xff] }
  0x33   :  { %659 = vmatpush.bf16.msrb.mxu1 %v988_v49 }
  0x34   :  { %705 = vmatpush.msrb.mxu3 %v34_v62  ;;  %v996_v62 = vld [vmem:[%s1311_s2 + $0x98] sm:$0xff]  ;;  %645 = vmatpush.bf16.msrb.mxu0 %v980_v61 }
  0x35   :  { %673 = vmatpush.bf16.msrb.mxu2 %v996_v62 }
  0x36   :  { %706 = vmatpush.msrb.mxu3 %v33_v63  ;;  %v985_v63 = vld [vmem:[%s1311_s2 + $0x40] sm:$0xff] }
  0x37   :  { %660 = vmatpush.bf16.msrb.mxu1 %v987_v54 }
  0x38   :  { %707 = vmatpush.msrb.mxu3 %v32_v0  ;;  %v979_v0 = vld [vmem:[%s1311_s2 + $0x10] sm:$0xff] }
  0x39   :  { %646 = vmatpush.bf16.msrb.mxu0 %v979_v0 }
  0x3a   :  { %708 = vmatpush.msrb.mxu3 %v31_v1  ;;  %v995_v1 = vld [vmem:[%s1311_s2 + $0x90] sm:$0xff] }
  0x3b   :  { %661 = vmatpush.bf16.msrb.mxu1 %v986_v58  ;;  %674 = vmatpush.bf16.msrb.mxu2 %v995_v1 }
  0x3c   :  { %709 = vmatpush.msrb.mxu3 %v30_v2 }
  0x3e   :  { %710 = vmatpush.msrb.mxu3 %v29_v3  ;;  %v978_v3 = vld [vmem:[%s1311_s2 + $0x8] sm:$0xff] }
  0x3f   :  { %662 = vmatpush.bf16.msrb.mxu1 %v985_v63  ;;  %647 = vmatpush.bf16.msrb.mxu0 %v978_v3 }
  0x40   :  { %711 = vmatpush.msrb.mxu3 %v28_v4  ;;  %v994_v4 = vld [vmem:[%s1311_s2 + $0x88] sm:$0xff] }
  0x41   :  { %675 = vmatpush.bf16.msrb.mxu2 %v994_v4 }
  0x42   :  { %712 = vmatpush.msrb.mxu3 %v27_v5 }
  0x44   :  { %713 = vmatpush.msrb.mxu3 %v26_v6 }
  0x46   :  { %714 = vmatpush.msrb.mxu3 %v25_v7  ;;  %v977_v7 = vld [vmem:[%s1311_s2] sm:$0xff] }
  0x47   :  { %648 = vmatpush.bf16.msrb.mxu0 %v977_v7 }
  0x48   :  { %715 = vmatpush.msrb.mxu3 %v24_v8  ;;  %v993_v8 = vld [vmem:[%s1311_s2 + $0x80] sm:$0xff] }
  0x49   :  { %676 = vmatpush.bf16.msrb.mxu2 %v993_v8 }
  0x9e   :  { %v297_v11 = vpop.f32.mrf.mxu0 }
  0x9f   :  { %v311_v12 = vpop.f32.mrf.mxu1 }
  0xa0   :  { %v312_v14 = vadd.f32 %v311_v12, %v297_v11 }
  0xa6   :  { %v325_v13 = vpop.f32.mrf.mxu2  ;;  %v299_v15 = vpop.f32.mrf.mxu0 }
  0xa7   :  { %v313_v16 = vpop.f32.mrf.mxu1  ;;  %v1194_v17 = vadd.f32 %v325_v13, %v312_v14  ;;  %v374_v14 = vld [vmem:[%s1312_s3] sm:$0x1] }
  0xa8   :  { %v314_v18 = vadd.f32 %v313_v16, %v299_v15 }
  0xa9   :  { %v337_v21 = vmul.f32 %v1194_v17, %v1194_v17 }
  0xae   :  { %v327_v19 = vpop.f32.mrf.mxu2 }
  0xaf   :  { %v1196_v20 = vadd.f32 %v327_v19, %v314_v18  ;;  %v390_v19 = vld [vmem:[%s1312_s3 + $0x1] sm:$0x1] }
  0xb1   :  { %v330_v22 = vadd.f32 %v1196_v20, %v1194_v17  ;;  %v338_v23 = vmul.f32 %v1196_v20, %v1196_v20 }
  0xb3   :  { %v331_v24 = vrot.slane %v330_v22, 4  ;;  %v339_v25 = vadd.f32 %v338_v23, %v337_v21 }
  0xb5   :  { %v332_v26 = vadd.f32 %v331_v24, %v330_v22  ;;  %v340_v27 = vrot.slane %v339_v25, 4 }
  0xb7   :  { %v333_v28 = vrot.slane %v332_v26, 2  ;;  %v341_v29 = vadd.f32 %v340_v27, %v339_v25 }
  0xb9   :  { %v334_v30 = vadd.f32 %v333_v28, %v332_v26  ;;  %v342_v31 = vrot.slane %v341_v29, 2 }
  0xbb   :  { %v335_v32 = vrot.slane %v334_v30, 1  ;;  %v343_v33 = vadd.f32 %v342_v31, %v341_v29 }
  0xbd   :  { %v344_v34 = vrot.slane %v343_v33, 1  ;;  %v336_v35 = vadd.f32 %v335_v32, %v334_v30 }
  0xbf   :  { %v345_v37 = vadd.f32 %v344_v34, %v343_v33 }
  0xc1   :  { %v347_v38 = vsel %vm66_vm0, %v336_v35, %v345_v37 }
  0xc2   :  { %364 = vmatmul.f32.vlgmr.msra.gmra.mxu3 %v347_v38 }
 0x145   :  { %v365_v48 = vpop.f32.mrf.mxu3 }
 0x146   :  { %v368_v50 = vmul.f32 %v365_v48, %v365_v48 }
 0x148   :  { %v370_v51 = vrot.slane %v368_v50, 7 }
 0x14a   :  { %v372_v55 = vsub.f32 %v365_v48, %v370_v51 }
 0x14c   :  { %v373_v59 = vmax.f32 %v372_v55, 0.0 }
 0x14e   :  { %v375_v60 = vadd.f32 1e-05, %v373_v59 }
 0x150   :  { %1001 = vrsqrt.f32 %v375_v60  ;;  %vm382_vm7 = vweird.f32 %v375_v60 }
 0x156   :  { %v1002_v2 = vpop.eup %1001 }
 0x157   :  { %v377_v5 = vmul.f32 %v1002_v2, %v375_v60  ;;  %vm383_vm6 = vweird.f32 %v1002_v2 }
 0x158   :  { %vm384_vm8 = vmor %vm382_vm7, %vm383_vm6 }
 0x159   :  { %v378_v6 = vmul.f32 %v1002_v2, %v377_v5 }
 0x15b   :  { %v379_v11 = vmul.f32 0.5, %v378_v6 }
 0x15d   :  { %v380_v12 = vsub.f32 1.5, %v379_v11 }
 0x15f   :  { %v381_v13 = vmul.f32 %v1002_v2, %v380_v12 }
 0x161   :  { %v385_v15 = vsel %vm384_vm8, %v1002_v2, %v381_v13 }
 0x162   :  { %v387_v16 = vrot.slane %v385_v15, 1 }
 0x164   :  { %v389_v18 = vmul.f32 %v387_v16, %v374_v14 }
 0x166   :  { %v391_v21 = vmul.f32 %v389_v18, %v365_v48  ;;  %v393_v22 = vperm.slane %v389_v18, 0 }
 0x168   :  { %v392_v23 = vsub.f32 %v390_v19, %v391_v21  ;;  %v394_v25 = vmul.f32 %v393_v22, %v1194_v17  ;;  %v395_v26 = vmul.f32 %v393_v22, %v1196_v20 }
 0x16a   :  { %v396_v24 = vperm.slane %v392_v23, 0 }
 0x16c   :  { %v397_v27 = vadd.f32 %v396_v24, %v394_v25  ;;  %v398_v28 = vadd.f32 %v396_v24, %v395_v26 }
 0x16e   :  { %v399_v29 = vmax.f32 %v397_v27, 0.0  ;;  %v400_v30 = vmax.f32 %v398_v28, 0.0 }
 0x170   :  { %v401_v31 = vpack.c.bf16 %v399_v29, %v399_v29  ;;  %v402_v32 = vpack.c.bf16 %v400_v30, %v400_v30 }
 0x172   :  { %v405_v33 = vunpack.c.l.b16 %v401_v31  ;;  %v406_v34 = vunpack.c.l.b16 %v402_v32 }
 0x174   :  { %v407_v35 = vpack.c.b16 %v405_v33, %v405_v33  ;;  %v408_v37 = vpack.c.b16 %v406_v34, %v406_v34  ;;  %v492_v38 = vpack.c.b16 %v406_v34, %v405_v33 }
 0x176   :  { %v410_v40 = vshrl.u32 %v407_v35, 16  ;;  %v413_v41 = vshll.u32 %v407_v35, 16  ;;  %v417_v42 = vshrl.u32 %v408_v37, 16  ;;  %v420_v43 = vshll.u32 %v408_v37, 16  ;;  %663 = vmatmul.bf16.vlgmr.msrb.gmra.mxu1 %v492_v38  ;;  %v726_v38 = vld [vmem:[%s1313_s4] sm:$0x1] }
 0x178   :  { %v412_v44 = vrot.slane %v410_v40, 7  ;;  %v419_v17 = vrot.slane %v417_v42, 7  ;;  %v427_v45 = vrot.slane %v413_v41, 1  ;;  %v429_v20 = vrot.slane %v420_v43, 1 }
 0x17a   :  { %v415_v46 = vor.u32 %v413_v41, %v412_v44  ;;  %v422_v47 = vor.u32 %v420_v43, %v419_v17  ;;  %v428_v48 = vor.u32 %v427_v45, %v410_v40  ;;  %v430_v49 = vor.u32 %v429_v20, %v417_v42  ;;  %v742_v43 = vld [vmem:[%s1313_s4 + $0x1] sm:$0x1] }
 0x17c   :  { %v425_v50 = vsel %vm1110_vm4, 0, %v415_v46  ;;  %v426_v51 = vsel %vm1110_vm4, 0, %v422_v47  ;;  %v433_v52 = vsel %vm1116_vm5, %v428_v48, 0  ;;  %v434_v53 = vsel %vm1116_vm5, %v430_v49, 0 }
 0x17d   :  { %v439_v54 = vunpack.c.l.b16 %v425_v50  ;;  %v441_v55 = vunpack.c.l.b16 %v426_v51  ;;  %v440_v56 = vunpack.c.l.b16 %v433_v52  ;;  %v442_v57 = vunpack.c.l.b16 %v434_v53 }
 0x17f   :  { %v491_v58 = vpack.c.b16 %v441_v55, %v439_v54  ;;  %v493_v59 = vpack.c.b16 %v442_v57, %v440_v56 }
 0x181   :  { %649 = vmatmul.bf16.vlgmr.msrb.gmra.mxu0 %v491_v58  ;;  %677 = vmatmul.bf16.vlgmr.msrb.gmra.mxu2 %v493_v59 }
 0x1f3   :  { %v664_v61 = vpop.f32.mrf.mxu1 }
 0x1fb   :  { %v666_v0 = vpop.f32.mrf.mxu1 }
 0x1fe   :  { %v650_v60 = vpop.f32.mrf.mxu0 }
 0x1ff   :  { %v665_v36 = vadd.f32 %v664_v61, %v650_v60 }
 0x204   :  { %v678_v62 = vpop.f32.mrf.mxu2 }
 0x205   :  { %v679_v1 = vadd.f32 %v678_v62, %v665_v36 }
 0x206   :  { %v652_v63 = vpop.f32.mrf.mxu0 }
 0x207   :  { %v667_v2 = vadd.f32 %v666_v0, %v652_v63  ;;  %v690_v39 = vmul.f32 %v679_v1, %v679_v1 }
 0x20c   :  { %v680_v3 = vpop.f32.mrf.mxu2 }
 0x20d   :  { %v681_v4 = vadd.f32 %v680_v3, %v667_v2 }
 0x20f   :  { %v683_v5 = vadd.f32 %v681_v4, %v679_v1  ;;  %v691_v6 = vmul.f32 %v681_v4, %v681_v4 }
 0x211   :  { %v684_v7 = vrot.slane %v683_v5, 4  ;;  %v692_v8 = vadd.f32 %v691_v6, %v690_v39 }
 0x213   :  { %v685_v11 = vadd.f32 %v684_v7, %v683_v5  ;;  %v693_v12 = vrot.slane %v692_v8, 4 }
 0x215   :  { %v686_v13 = vrot.slane %v685_v11, 2  ;;  %v694_v14 = vadd.f32 %v693_v12, %v692_v8 }
 0x217   :  { %v687_v15 = vadd.f32 %v686_v13, %v685_v11  ;;  %v695_v16 = vrot.slane %v694_v14, 2 }
 0x219   :  { %v688_v18 = vrot.slane %v687_v15, 1  ;;  %v696_v19 = vadd.f32 %v695_v16, %v694_v14 }
 0x21b   :  { %v697_v21 = vrot.slane %v696_v19, 1  ;;  %v689_v22 = vadd.f32 %v688_v18, %v687_v15 }
 0x21d   :  { %v698_v23 = vadd.f32 %v697_v21, %v696_v19 }
 0x21f   :  { %v699_v24 = vsel %vm66_vm0, %v689_v22, %v698_v23 }
 0x220   :  { %716 = vmatmul.f32.vlgmr.msrb.gmra.mxu3 %v699_v24 }
 0x2a3   :  { %v717_v25 = vpop.f32.mrf.mxu3 }
 0x2a4   :  { %v720_v26 = vmul.f32 %v717_v25, %v717_v25 }
 0x2a6   :  { %v722_v27 = vrot.slane %v720_v26, 7 }
 0x2a8   :  { %v724_v28 = vsub.f32 %v717_v25, %v722_v27 }
 0x2aa   :  { %v725_v29 = vmax.f32 %v724_v28, 0.0 }
 0x2ac   :  { %v727_v30 = vadd.f32 1e-05, %v725_v29 }
 0x2ae   :  { %1003 = vrsqrt.f32 %v727_v30  ;;  %vm734_vm10 = vweird.f32 %v727_v30 }
 0x2b4   :  { %v1004_v31 = vpop.eup %1003 }
 0x2b5   :  { %v729_v32 = vmul.f32 %v1004_v31, %v727_v30  ;;  %vm735_vm9 = vweird.f32 %v1004_v31 }
 0x2b6   :  { %vm736_vm11 = vmor %vm734_vm10, %vm735_vm9 }
 0x2b7   :  { %v730_v33 = vmul.f32 %v1004_v31, %v729_v32 }
 0x2b9   :  { %v731_v34 = vmul.f32 0.5, %v730_v33 }
 0x2bb   :  { %v732_v35 = vsub.f32 1.5, %v731_v34 }
 0x2bd   :  { %v733_v37 = vmul.f32 %v1004_v31, %v732_v35 }
 0x2bf   :  { %v737_v40 = vsel %vm736_vm11, %v1004_v31, %v733_v37 }
 0x2c0   :  { %v739_v41 = vrot.slane %v737_v40, 1 }
 0x2c2   :  { %v741_v42 = vmul.f32 %v739_v41, %v726_v38 }
 0x2c4   :  { %v743_v44 = vmul.f32 %v741_v42, %v717_v25  ;;  %v745_v17 = vperm.slane %v741_v42, 0 }
 0x2c6   :  { %v744_v45 = vsub.f32 %v742_v43, %v743_v44  ;;  %v746_v20 = vmul.f32 %v745_v17, %v679_v1  ;;  %v747_v46 = vmul.f32 %v745_v17, %v681_v4 }
 0x2c8   :  { %v748_v47 = vperm.slane %v744_v45, 0 }
 0x2ca   :  { %v749_v48 = vadd.f32 %v748_v47, %v746_v20  ;;  %v750_v49 = vadd.f32 %v748_v47, %v747_v46 }
 0x2cc   :  { %v751_v50 = vadd.f32 %v749_v48, %v1070_v9  ;;  %v752_v51 = vadd.f32 %v750_v49, %v1075_v10 }
 0x2ce   :  { %v753_v52 = vmax.f32 %v751_v50, 0.0  ;;  %v754_v53 = vmax.f32 %v752_v51, 0.0 }
 0x2d0   :  { %755 = vst [vmem:[%s1314_s6] sm:$0xff] %v753_v52 }
 0x2d1   :  { %756 = vst [vmem:[%s1314_s6 + $0x8] sm:$0xff] %v754_v53 }

</bundles_post_ra>
